<compile_context>
chip_gen: v6e
topology: v6e:2x2x1
jax: 0.10.0
libtpu: 0.0.40
codegen_flags: <defaults>
</compile_context>

<pallas_src>
import math

import jax
import jax.numpy as jnp
from jax import lax
from jax.experimental import pallas as pl
from jax.experimental.pallas import tpu as pltpu


def _round_up(x, m):
    return ((x + m - 1) // m) * m


# -----------------------------------------------------------------------------
# Kernel 1: batch-invariant K/V projection — computed ONCE per forward call.
# -----------------------------------------------------------------------------
def _kv_proj_kernel(prot_ref, wk_ref, wv_ref, k_ref, v_ref):
    """prot (N,P), wk/wv (P,d_k) -> K,V (N,d_k). Two tile-aligned MXU matmuls."""
    prot = prot_ref[...]
    k_ref[...] = jnp.dot(prot, wk_ref[...],
                         preferred_element_type=jnp.float32).astype(k_ref.dtype)
    v_ref[...] = jnp.dot(prot, wv_ref[...],
                         preferred_element_type=jnp.float32).astype(v_ref.dtype)


# -----------------------------------------------------------------------------
# Kernel 2: per-batch-tile Q projection + attention + fused concat store.
# -----------------------------------------------------------------------------
def _attn_kernel(lig_ref, wq_ref, k_ref, v_ref, out_ref):
    """
    lig_ref : (TB, L)        ligand tile (streamed, original I/O dtype)
    wq_ref  : (L, d_k)       Wq^T with 1/sqrt(d_k) folded in (compute dtype)
    k_ref   : (N, d_k)       precomputed K (resident, compute dtype)
    v_ref   : (N, d_k)       precomputed V (resident, compute dtype)
    out_ref : (TB, L + d_k)  fused [ligand_rep, context]
    """
    cdt = wq_ref.dtype                       # compute dtype (bf16 in production)
    lig = lig_ref[...]                       # keep original dtype for exact passthrough

    # Q projection (scale already folded into Wq); f32 accumulation.   (TB, d_k)
    q = jnp.dot(lig.astype(cdt), wq_ref[...], preferred_element_type=jnp.float32)

    # logits = Q @ K^T without materializing a transpose (contract d_k of both).
    logits = lax.dot_general(
        q.astype(cdt), k_ref[...],
        dimension_numbers=(((1,), (1,)), ((), ())),
        preferred_element_type=jnp.float32)                            # (TB, N)

    # Row-stable softmax kept in f32; normalization deferred past the PV matmul.
    m = jnp.max(logits, axis=-1, keepdims=True)
    p = jnp.exp(logits - m)                                            # EUP, f32
    denom = jnp.sum(p, axis=-1, keepdims=True)                         # (TB, 1)

    # Context with unnormalized weights, then one cheap (TB, d_k) scale.
    ctx = jnp.dot(p.astype(cdt), v_ref[...], preferred_element_type=jnp.float32)
    # approx=True would put the divide on the otherwise-idle EUP (~1e-3 error);
    # keep exact form so the f32 path holds a 1e-5 tolerance vs. the reference.
    ctx = ctx * pl.reciprocal(denom, approx=False)

    # Fused concat -> single store of the whole (TB, L + d_k) block.
    # TODO(synk): if the consumer can take (ligand_rep, ctx) unconcatenated (or
    # L, d_k are padded to 128-lane multiples), skip this passthrough writeback.
    out_ref[...] = jnp.concatenate(
        [lig.astype(out_ref.dtype), ctx.astype(out_ref.dtype)], axis=-1)


# -----------------------------------------------------------------------------
# One-time weight prep (do NOT call per forward).
# -----------------------------------------------------------------------------
def prepare_cross_modal_weights(wq, wk, wv, compute_dtype=jnp.bfloat16):
    """
    wq : (d_k, ligand_dim)   torch nn.Linear weight layout
    wk : (d_k, protein_dim)
    wv : (d_k, protein_dim)
    returns (wq_t, wk_t, wv_t) pre-transposed in `compute_dtype`,
    with 1/sqrt(d_k) folded into wq_t.
    """
    d_k = wq.shape[0]
    scale = 1.0 / math.sqrt(d_k)
    wq_t = (wq.T.astype(jnp.float32) * scale).astype(compute_dtype)
    wk_t = wk.T.astype(compute_dtype)
    wv_t = wv.T.astype(compute_dtype)
    return wq_t, wk_t, wv_t


def _pick_batch_tile(B):
    """Full batch when tiny; otherwise >=2 grid steps (v7x megacore), tiles of
    up to 512 rows (v6e sweet spot), multiple of 8 sublanes."""
    if B <= 64:
        return B
    return min(512, _round_up(pl.cdiv(B, 2), 8))


def cross_modal_attention(ligand_rep, protein_embed, wq_t, wk_t, wv_t,
                          *, batch_tile=None):
    """Pallas-backed CrossModalAttention.forward.

    ligand_rep    : (B, ligand_dim)
    protein_embed : (N_prot, protein_dim)
    wq_t/wk_t/wv_t: outputs of prepare_cross_modal_weights
    returns       : (B, ligand_dim + d_k)
    """
    B, L = ligand_rep.shape
    N, P = protein_embed.shape
    d_k = wq_t.shape[1]
    out_dim = L + d_k
    cdt = wq_t.dtype
    cdt_bytes = jnp.dtype(cdt).itemsize
    io_bytes = jnp.dtype(ligand_rep.dtype).itemsize

    # --- Batch-invariant K/V projection: one tiny pallas_call, NOT per tile. ---
    # TODO(synk): tile N_prot / protein_dim here (and use an online-softmax
    # accumulator in the attention kernel) for very large protein tables.
    kv_cost = pl.CostEstimate(
        flops=2 * 2 * N * P * d_k,
        transcendentals=0,
        bytes_accessed=(N * P + 2 * P * d_k + 2 * N * d_k) * cdt_bytes)
    k, v = pl.pallas_call(
        _kv_proj_kernel,
        out_shape=(jax.ShapeDtypeStruct((N, d_k), cdt),
                   jax.ShapeDtypeStruct((N, d_k), cdt)),
        cost_estimate=kv_cost,
    )(protein_embed.astype(cdt), wk_t, wv_t)

    # --- Batch-tiled attention. ---
    TB = batch_tile if batch_tile is not None else _pick_batch_tile(B)
    grid = (pl.cdiv(B, TB),)

    # Explicit VMEM budget: residents (Wq, K, V) + streamed lig/out tiles, all
    # pessimistically counted double-buffered, with 2x headroom; clamp to a
    # range that is safe on v5e (16 MiB default scoped) through v7x (64 MiB).
    # TODO(synk): single-buffer the grid-invariant Wq/K/V specs via
    # pipeline_mode=pl.Buffered(1) to halve their VMEM on tight parts.
    resident = (L * d_k + 2 * N * d_k) * cdt_bytes
    streamed = (TB * L + TB * out_dim) * io_bytes
    vmem_limit = int(min(max(4 * (resident + streamed), 32 << 20), 64 << 20))

    attn_cost = pl.CostEstimate(
        flops=2 * B * d_k * (L + 2 * N),
        transcendentals=B * N,
        bytes_accessed=(B * L + B * out_dim) * io_bytes
                       + (L * d_k + 2 * N * d_k) * cdt_bytes)

    out = pl.pallas_call(
        _attn_kernel,
        out_shape=jax.ShapeDtypeStruct((B, out_dim), ligand_rep.dtype),
        grid_spec=pltpu.PrefetchScalarGridSpec(
            num_scalar_prefetch=0,
            grid=grid,
            in_specs=[
                pl.BlockSpec((TB, L), lambda i: (i, 0)),      # ligand tile (streamed)
                pl.BlockSpec((L, d_k), lambda i: (0, 0)),     # Wq (resident)
                pl.BlockSpec((N, d_k), lambda i: (0, 0)),     # K  (resident)
                pl.BlockSpec((N, d_k), lambda i: (0, 0)),     # V  (resident)
            ],
            out_specs=pl.BlockSpec((TB, out_dim), lambda i: (i, 0)),
        ),
        compiler_params=pltpu.CompilerParams(
            dimension_semantics=("parallel",),
            vmem_limit_bytes=vmem_limit),
        cost_estimate=attn_cost,
    )(ligand_rep, wq_t, k, v)
    return out


def _reference(ligand_rep, protein_embed, wq, wk, wv):
    """Pure-JAX reference mirroring the PyTorch module."""
    d_k = wq.shape[0]
    q = ligand_rep @ wq.T
    k = protein_embed @ wk.T
    v = protein_embed @ wv.T
    logits = (q @ k.T) / jnp.sqrt(jnp.float32(d_k))
    w = jax.nn.softmax(logits, axis=-1)
    ctx = w @ v
    return jnp.concatenate([ligand_rep, ctx], axis=1)


if __name__ == "__main__":
    # Small, deterministic example shapes consistent with the module.
    B = 2             # batch
    LIGAND_DIM = 32
    PROTEIN_DIM = 48
    N_PROT = 8        # number of protein embedding rows
    D_K = LIGAND_DIM  # out_dim defaults to ligand_dim in the module

    key = jax.random.PRNGKey(0)
    k1, k2, k3, k4, k5, k6 = jax.random.split(key, 6)

    ligand_rep = jax.random.normal(k1, (B, LIGAND_DIM), dtype=jnp.float32)
    protein_embed = jax.random.normal(k2, (N_PROT, PROTEIN_DIM), dtype=jnp.float32)

    # Deterministic parameter init (nn.Linear-style uniform bounds), no checkpoint load.
    def init_linear(k, out_dim, in_dim):
        bound = 1.0 / math.sqrt(in_dim)
        return jax.random.uniform(k, (out_dim, in_dim), jnp.float32, -bound, bound)

    wq = init_linear(k3, D_K, LIGAND_DIM)
    wk = init_linear(k4, D_K, PROTEIN_DIM)
    wv = init_linear(k5, D_K, PROTEIN_DIM)

    expected = _reference(ligand_rep, protein_embed, wq, wk, wv)

    # --- f32 compute path: tight check against the f32 reference. ---
    wq32, wk32, wv32 = prepare_cross_modal_weights(wq, wk, wv,
                                                   compute_dtype=jnp.float32)
    fused32 = jax.block_until_ready(
        cross_modal_attention(ligand_rep, protein_embed, wq32, wk32, wv32))
    assert fused32.shape == (B, LIGAND_DIM + D_K), fused32.shape
    assert jnp.allclose(fused32, expected, atol=1e-5, rtol=1e-5), "f32 mismatch"

    # --- bf16 compute path (production default): ligand passthrough stays exact,
    #     context within bf16 tolerance of the f32 reference. ---
    wqb, wkb, wvb = prepare_cross_modal_weights(wq, wk, wv,
                                                compute_dtype=jnp.bfloat16)
    fused_bf = jax.block_until_ready(
        cross_modal_attention(ligand_rep, protein_embed, wqb, wkb, wvb))
    assert fused_bf.shape == (B, LIGAND_DIM + D_K), fused_bf.shape
    assert jnp.array_equal(fused_bf[:, :LIGAND_DIM], ligand_rep), "passthrough changed"
    assert jnp.allclose(fused_bf, expected, atol=5e-2, rtol=5e-2), "bf16 mismatch"

    # --- Partial final batch tile (B not a multiple of TB) is handled correctly. ---
    lig_odd = jax.random.normal(k6, (10, LIGAND_DIM), dtype=jnp.float32)
    fused_odd = jax.block_until_ready(
        cross_modal_attention(lig_odd, protein_embed, wq32, wk32, wv32, batch_tile=8))
    exp_odd = _reference(lig_odd, protein_embed, wq, wk, wv)
    assert jnp.allclose(fused_odd, exp_odd, atol=1e-5, rtol=1e-5), "partial-tile mismatch"

    print("KERNEL_OK")
</pallas_src>

<mosaic_0001>
module attributes {stable_mosaic.version = 11 : i64} {
  func.func @_kv_proj_kernel(%arg0: memref<8x48xf32, #tpu.memory_space<vmem>>, %arg1: memref<48x32xf32, #tpu.memory_space<vmem>>, %arg2: memref<48x32xf32, #tpu.memory_space<vmem>>, %arg3: memref<8x32xf32, #tpu.memory_space<vmem>>, %arg4: memref<8x32xf32, #tpu.memory_space<vmem>>) attributes {dimension_semantics = [], scalar_prefetch = 0 : i64, scratch_operands = 0 : i64, tpu.core_type = #tpu.core_type<tc>} {
    %c0 = arith.constant 0 : index
    %c0_0 = arith.constant 0 : index
    %0 = vector.load %arg0[%c0, %c0_0] : memref<8x48xf32, #tpu.memory_space<vmem>>, vector<8x48xf32>
    %c0_1 = arith.constant 0 : index
    %c0_2 = arith.constant 0 : index
    %1 = vector.load %arg1[%c0_1, %c0_2] : memref<48x32xf32, #tpu.memory_space<vmem>>, vector<48x32xf32>
    %cst = arith.constant dense<0.000000e+00> : vector<8x32xf32>
    %2 = tpu.matmul %0, %1, %cst {dimension_numbers = #tpu.dot_dimension_numbers<[1], [0], [0], [1], [0, 0, 1, 1], [], []>} : vector<8x48xf32>, vector<48x32xf32>, vector<8x32xf32> -> vector<8x32xf32>
    %c0_3 = arith.constant 0 : index
    %c0_4 = arith.constant 0 : index
    %3 = vector.load %arg3[%c0_3, %c0_4] : memref<8x32xf32, #tpu.memory_space<vmem>>, vector<8x32xf32>
    tpu.vector_store %arg3[%c0_3, %c0_4], %2 {strides = array<i32>} : memref<8x32xf32, #tpu.memory_space<vmem>>, vector<8x32xf32>,
    %c0_5 = arith.constant 0 : index
    %c0_6 = arith.constant 0 : index
    %4 = vector.load %arg2[%c0_5, %c0_6] : memref<48x32xf32, #tpu.memory_space<vmem>>, vector<48x32xf32>
    %cst_7 = arith.constant dense<0.000000e+00> : vector<8x32xf32>
    %5 = tpu.matmul %0, %4, %cst_7 {dimension_numbers = #tpu.dot_dimension_numbers<[1], [0], [0], [1], [0, 0, 1, 1], [], []>} : vector<8x48xf32>, vector<48x32xf32>, vector<8x32xf32> -> vector<8x32xf32>
    %c0_8 = arith.constant 0 : index
    %c0_9 = arith.constant 0 : index
    %6 = vector.load %arg4[%c0_8, %c0_9] : memref<8x32xf32, #tpu.memory_space<vmem>>, vector<8x32xf32>
    tpu.vector_store %arg4[%c0_8, %c0_9], %5 {strides = array<i32>} : memref<8x32xf32, #tpu.memory_space<vmem>>, vector<8x32xf32>,
    return
  }
}

</mosaic_0001>

<bundles_post_ra>
// kernel: tpu_custom_call.1
= control target key start
LH: loop header
LB: loop body
LE: loop exit
PB: predicated region body
PF: predicated region fallthrough
CT: control target
= control target key end

     0   :  { %10 = vsyncpa [#allocation3], 0  ;;  %v300_v2 = vmov 0.0   ;;  %s374_s0 = inlined_call_operand.vmem [shape: f32[8,48], index: 0, kind: input, shape index: {}]   ;;  %s375_s1 = inlined_call_operand.vmem [shape: f32[48,32], index: 1, kind: input, shape index: {}]   ;;  %s376_s2 = inlined_call_operand.vmem [shape: f32[48,32], index: 2, kind: input, shape index: {}]   ;;  %s377_s3 = inlined_call_operand.hbm [shape: f32[8,32], index: 3, kind: output, shape index: {0}]   ;;  %s378_s4 = inlined_call_operand.hbm [shape: f32[8,32], index: 4, kind: output, shape index: {1}]  }
   0x1   :  { %v24_v0 = vld [vmem:[%s375_s1 + $0x28] sm:$0xff]  ;;  %222 = vmatprep.subr.mxu0 %v300_v2  ;;  %237 = vmatprep.subr.mxu1 %v300_v2  ;;  %v23_v3 = vld [vmem:[%s375_s1 + $0x20] sm:$0xff]  ;;  %v22_v5 = vld [vmem:[%s375_s1 + $0x18] sm:$0xff] }
   0x2   :  { %v106_v1 = vld [vmem:[%s376_s2 + $0x28] sm:$0xff]  ;;  %v105_v4 = vld [vmem:[%s376_s2 + $0x20] sm:$0xff]  ;;  %223 = vmatpush3.msra.mxu0 %v24_v0  ;;  %v104_v6 = vld [vmem:[%s376_s2 + $0x18] sm:$0xff] }
   0x3   :  { %238 = vmatpush3.msra.mxu1 %v106_v1  ;;  %224 = vmatprep.subr.mxu0 %v300_v2 }
   0x4   :  { %239 = vmatprep.subr.mxu1 %v300_v2  ;;  %225 = vmatpush3.msra.mxu0 %v23_v3 }
   0x5   :  { %240 = vmatpush3.msra.mxu1 %v105_v4 }
   0x6   :  { %11 = vsyncpa [#allocation5], 0  ;;  %226 = vmatprep.subr.mxu0 %v300_v2  ;;  %241 = vmatprep.subr.mxu1 %v300_v2  ;;  %v21_v7 = vld [vmem:[%s375_s1 + $0x10] sm:$0xff]  ;;  %v20_v9 = vld [vmem:[%s375_s1 + $0x8] sm:$0xff]  ;;  %vm25_vm0 = vcmask 392192   ;;  %vm301_vm1 = vmmov 0  }
   0x7   :  { %v103_v8 = vld [vmem:[%s376_s2 + $0x10] sm:$0xff]  ;;  %227 = vmatpush3.msra.mxu0 %v22_v5  ;;  %242 = vmatpush3.msra.mxu1 %v104_v6  ;;  %v102_v10 = vld [vmem:[%s376_s2 + $0x8] sm:$0xff]  ;;  %v19_v11 = vld [vmem:[%s375_s1] sm:$0xff]  ;;  %s302_s1 = smov [#allocation2]   ;;  %s303_s16 = smov [#allocation4]   ;;  %vm99_vm2 = vcmask 261120  }
   0x8   :  { %228 = vmatprep.subr.mxu0 %v300_v2  ;;  %243 = vmatprep.subr.mxu1 %v300_v2  ;;  %v101_v12 = vld [vmem:[%s376_s2] sm:$0xff]  ;;  %s184_s15 = sshll.u32 %s302_s1, 4  ;;  %s194_s17 = sshll.u32 %s303_s16, 4  ;;  %s185_s15 = int_to_ptr.vmem [resolvable:$true] %s184_s15  ;;  %s195_s17 = int_to_ptr.vmem [resolvable:$true] %s194_s17 }
   0x9   :  { %229 = vmatpush3.msra.mxu0 %v21_v7  ;;  %244 = vmatpush3.msra.mxu1 %v103_v8  ;;  %v18_v13 = vld [vmem:[%s374_s0] sm:$0xff]  ;;  %s256_s0 = scalar_lea.vmem %s185_s15, 128  ;;  %p261_p1 = scmp.lt.s32.totalorder %s185_s15, %s185_s15 }
   0xa   :  { %230 = vmatprep.subr.mxu0 %v300_v2  ;;  %245 = vmatprep.subr.mxu1 %v300_v2  ;;  %p257_p0 = scmp.ne.s32.totalorder %s185_s15, %s256_s0  ;;  %p262_p2 = scmp.lt.s32.totalorder %s256_s0, %s256_s0 }
   0xb   :  { %231 = vmatpush3.msra.mxu0 %v20_v9  ;;  %246 = vmatpush3.msra.mxu1 %v102_v10 }
   0xc   :  { %232 = vmatprep.subr.mxu0 %v300_v2  ;;  %247 = vmatprep.subr.mxu1 %v300_v2  ;;  %p263_p3 = por %p262_p2, %p261_p1 }
   0xd   :  { %233 = vmatpush3.msra.mxu0 %v19_v11  ;;  %234 = vmatprep.mubr.msk.f32.mxu0 %vm301_vm1, %v300_v2 }
   0xe   :  { %248 = vmatpush3.msra.mxu1 %v101_v12  ;;  %249 = vmatprep.mubr.msk.f32.mxu1 %vm301_vm1, %v300_v2  ;;  %p264_p4 = pnand %p263_p3, %p257_p0 }
   0xf   :  { %235 = vmatmul.mubr.msk.f32.vlgmr.msra.gmra.mxu0 %vm25_vm0, %v18_v13  ;;  %250 = vmatmul.mubr.msk.f32.vlgmr.msra.gmra.mxu1 %vm25_vm0, %v18_v13 }
  0xcf   :  { %v95_v14 = vpop.f32.mrf.mxu0  ;;  %v173_v15 = vpop.f32.mrf.mxu1 }
  0xd0   :  { %177 = vst.msk [vmem:[#allocation4] sm:$0xff] %vm99_vm2, %v173_v15  ;;  %100 = vst.msk [vmem:[#allocation2] sm:$0xff] %vm99_vm2, %v95_v14 }
  0xd1   :  { %v236_v16 = vpop.f32.mrf.mxu0  ;;  %v251_v17 = vpop.f32.mrf.mxu1 }
  0xd2   :  { %267 = shalt.err (!%p264_p4)
}
  0xd3   :  { %187 = dma.vmem_to_hbm [thread:$0]  %s185_s15, 128, %s377_s3, [#allocation3]  }
  0xd4   :  { %s276_s19 = scalar_lea.vmem %s195_s17, 128  ;;  %p281_p6 = scmp.lt.s32.totalorder %s195_s17, %s195_s17 }
  0xd5   :  { %p277_p5 = scmp.ne.s32.totalorder %s195_s17, %s276_s19  ;;  %p282_p7 = scmp.lt.s32.totalorder %s276_s19, %s276_s19 }
  0xd7   :  { %p283_p8 = por %p282_p7, %p281_p6 }
  0xd9   :  { %p284_p9 = pnand %p283_p8, %p277_p5 }
  0xdb   :  { %287 = shalt.err (!%p284_p9)
}
  0xdc   :  { %197 = dma.vmem_to_hbm [thread:$0]  %s195_s17, 128, %s378_s4, [#allocation5]  }
  0xdd   :  { %296 = dma.done.wait [#allocation3], 128  }
  0xde   :  { %297 = vsyncadd [#allocation3], 4294967168 }
  0xdf   :  { %298 = dma.done.wait [#allocation5], 128  }
  0xe0   :  { %299 = vsyncadd [#allocation5], 4294967168 }
  0xe1   :  { %204 = vsyncpa [#allocation3], 1 }
  0xe2   :  { %205 = vsyncpa [#allocation5], 1 }

</bundles_post_ra>
